<compile_context>
chip_gen: v6e
topology: v6e:2x2x1
jax: 0.10.0
libtpu: 0.0.40
codegen_flags: <defaults>
</compile_context>

<pallas_src>
import jax
import jax.numpy as jnp
from jax.experimental import pallas as pl
from jax.experimental.pallas import tpu as pltpu


def _round_up(x: int, m: int) -> int:
    return ((x + m - 1) // m) * m


# ---------------------------------------------------------------------------
# Kernels
# ---------------------------------------------------------------------------
def _linear_kernel_fused(x_ref, w_ref, b_ref, o_ref):
    """Single K-step path: whole reduction in one tile -> no accumulator,
    no control flow, one lane-dense store."""
    o_ref[...] = (
        jnp.dot(x_ref[...], w_ref[...], preferred_element_type=jnp.float32)
        + b_ref[...].astype(jnp.float32)
    ).astype(o_ref.dtype)


def _linear_kernel_accum_out(x_ref, w_ref, b_ref, o_ref):
    """Multi K-step, f32 output: accumulate directly into the resident output
    block (its index_map is K-invariant) -> no VMEM scratch."""
    k = pl.program_id(2)

    @pl.when(k == 0)
    def _():
        o_ref[...] = jnp.zeros_like(o_ref)

    o_ref[...] += jnp.dot(x_ref[...], w_ref[...], preferred_element_type=jnp.float32)

    @pl.when(k == pl.num_programs(2) - 1)
    def _():
        # Bias added exactly once, on the final reduction step.
        o_ref[...] += b_ref[...].astype(o_ref.dtype)


def _linear_kernel_accum_scratch(x_ref, w_ref, b_ref, o_ref, acc_ref):
    """Multi K-step, low-precision output: f32 VMEM accumulator, cast once."""
    k = pl.program_id(2)

    @pl.when(k == 0)
    def _():
        acc_ref[...] = jnp.zeros_like(acc_ref)

    acc_ref[...] += jnp.dot(x_ref[...], w_ref[...], preferred_element_type=jnp.float32)

    @pl.when(k == pl.num_programs(2) - 1)
    def _():
        o_ref[...] = (acc_ref[...] + b_ref[...].astype(jnp.float32)).astype(o_ref.dtype)


# ---------------------------------------------------------------------------
# Model wrapper (transpose / pad of parameters hoisted out of the call path)
# ---------------------------------------------------------------------------
class PallasLogisticRegression:
    """y = x @ weight.T + bias  (same semantics as torch nn.Linear forward)."""

    def __init__(self, weight, bias, *, compute_dtype=None):
        C, D = weight.shape
        assert bias.shape == (C,), bias.shape
        self._C, self._D = int(C), int(D)
        self._Cp = _round_up(self._C, 128)
        self._Dp = _round_up(self._D, 128)
        self._compute_dtype = None if compute_dtype is None else jnp.dtype(compute_dtype)

        # Pre-transpose + zero-pad ONCE (classes land on the lane axis).
        w_t = jnp.asarray(weight).T  # (D, C)
        if self._compute_dtype is not None:
            w_t = w_t.astype(self._compute_dtype)
        self._w_p = jnp.pad(w_t, ((0, self._Dp - self._D), (0, self._Cp - self._C)))
        self._b_p = jnp.pad(
            jnp.asarray(bias, dtype=jnp.float32).reshape(1, self._C),
            ((0, 0), (0, self._Cp - self._C)),
        )

        self._vmem_budget = self._query_vmem_budget()
        self._cache = {}

    @staticmethod
    def _query_vmem_budget() -> int:
        # ~75% of physical VMEM: ~48 MiB on v7x (64 MiB), ~96 MiB on v5e/v6e (128 MiB).
        try:
            cap = int(pltpu.get_tpu_info().vmem_capacity_bytes)
        except Exception:
            cap = 64 * 1024 * 1024  # conservative v7x-sized fallback
        return min((cap * 3) // 4, 100 * 1024 * 1024)

    # -- tile selection ------------------------------------------------------
    def _select_tiles(self, B: int, in_bytes: int, out_bytes: int):
        Bp0 = _round_up(max(B, 1), 8)
        budget = int(self._vmem_budget * 0.9)  # headroom for compiler scratch

        def fits(tm, tk, tn):
            ws = (
                2 * (tm * tk + tk * tn) * in_bytes  # double-buffered x / W tiles
                + 2 * tn * 4                        # double-buffered bias tile
                + 2 * tm * tn * out_bytes           # double-buffered output tile
                + tm * tn * 4                       # possible f32 accumulator
            )
            return ws <= budget

        # Candidates (largest first); tk / tn must divide the padded dims.
        tk_cands = [d for d in range(self._Dp, 127, -128) if self._Dp % d == 0]
        tn_cands = [d for d in range(self._Cp, 127, -128) if self._Cp % d == 0]
        tm_cands = [t for t in (512, 256, 128, 64, 32, 16, 8) if t <= Bp0]
        if Bp0 < 512 and (not tm_cands or tm_cands[0] < Bp0):
            tm_cands = [Bp0] + tm_cands

        def pick(cands, ok):
            for c in cands:
                if ok(c):
                    return c
            return cands[-1]

        # Priority for this mem-bound GEMM:
        #  (1) tn = Cp  -> class-tile axis collapses, x streamed from HBM once
        #  (2) big tm   -> amortize weight reads / fill the 256-wide MXU
        #  (3) big tk   -> fewer grid steps; tk == Dp enables the fused path
        tn = pick(tn_cands, lambda t: fits(tm_cands[-1], tk_cands[-1], t))
        tm = pick(tm_cands, lambda t: fits(t, tk_cands[-1], tn))
        tk = pick(tk_cands, lambda t: fits(tm, t, tn))

        Bp = _round_up(B, tm)
        return tm, tn, tk, Bp

    # -- compiled forward per (batch, dtype) ----------------------------------
    def _get_forward(self, B: int, x_dtype):
        out_dtype = jnp.dtype(x_dtype)
        key = (B, out_dtype.name)
        if key in self._cache:
            return self._cache[key]

        in_dtype = out_dtype if self._compute_dtype is None else self._compute_dtype
        tm, tn, tk, Bp = self._select_tiles(B, in_dtype.itemsize, out_dtype.itemsize)
        grid = (Bp // tm, self._Cp // tn, self._Dp // tk)

        if grid[2] == 1:
            kernel, scratch = _linear_kernel_fused, []
        elif out_dtype == jnp.float32:
            kernel, scratch = _linear_kernel_accum_out, []
        else:
            kernel, scratch = (
                _linear_kernel_accum_scratch,
                [pltpu.VMEM((tm, tn), jnp.float32)],
            )

        call = pl.pallas_call(
            kernel,
            out_shape=jax.ShapeDtypeStruct((Bp, self._Cp), out_dtype),
            grid_spec=pltpu.PrefetchScalarGridSpec(
                num_scalar_prefetch=0,
                grid=grid,
                in_specs=[
                    pl.BlockSpec((tm, tk), lambda i, j, k: (i, k)),  # x tile
                    pl.BlockSpec((tk, tn), lambda i, j, k: (k, j)),  # W^T tile
                    pl.BlockSpec((1, tn), lambda i, j, k: (0, j)),   # bias tile
                ],
                out_specs=pl.BlockSpec((tm, tn), lambda i, j, k: (i, j)),
                scratch_shapes=scratch,
            ),
            compiler_params=pltpu.CompilerParams(
                dimension_semantics=("parallel", "parallel", "arbitrary"),
                vmem_limit_bytes=self._vmem_budget,
            ),
        )

        C, D, Cp, Dp = self._C, self._D, self._Cp, self._Dp
        cast_to = self._compute_dtype

        def forward(x, w_p, b_p):
            xp = x
            if cast_to is not None and xp.dtype != cast_to:
                xp = xp.astype(cast_to)
            if Bp != B or Dp != D:  # zero-padded K columns contribute 0 to the dot
                xp = jnp.pad(xp, ((0, Bp - B), (0, Dp - D)))
            out_p = call(xp, w_p, b_p)
            if Bp != B or Cp != C:
                out_p = out_p[:B, :C]
            return out_p

        fwd = jax.jit(forward)
        self._cache[key] = fwd
        return fwd

    def __call__(self, x):
        assert x.ndim == 2 and x.shape[1] == self._D, x.shape
        fwd = self._get_forward(int(x.shape[0]), x.dtype)
        return fwd(x, self._w_p, self._b_p)


if __name__ == "__main__":
    # Small shapes consistent with the module: batch=8, input_dim=32, num_classes=16.
    batch, input_dim, num_classes = 8, 32, 16

    key = jax.random.PRNGKey(0)
    kx, kw, kb = jax.random.split(key, 3)

    x = jax.random.normal(kx, (batch, input_dim), dtype=jnp.float32)
    # Deterministic init mimicking nn.Linear's uniform(-1/sqrt(D), 1/sqrt(D)).
    bound = 1.0 / jnp.sqrt(jnp.float32(input_dim))
    weight = jax.random.uniform(
        kw, (num_classes, input_dim), minval=-bound, maxval=bound, dtype=jnp.float32
    )
    bias = jax.random.uniform(
        kb, (num_classes,), minval=-bound, maxval=bound, dtype=jnp.float32
    )

    model = PallasLogisticRegression(weight, bias)
    out = jax.block_until_ready(model(x))

    # Correctness check against plain JAX reference (raw logits, no sigmoid —
    # the reference module's forward is bare nn.Linear).
    ref = x @ weight.T + bias
    assert out.shape == (batch, num_classes), out.shape
    assert jnp.allclose(out, ref, atol=1e-4, rtol=1e-4)

    print("KERNEL_OK")
</pallas_src>

<mosaic_0001>
module attributes {stable_mosaic.version = 11 : i64} {
  func.func @_linear_kernel_fused(%arg0: i32, %arg1: i32, %arg2: i32, %arg3: memref<8x128xf32, #tpu.memory_space<vmem>>, %arg4: memref<128x128xf32, #tpu.memory_space<vmem>>, %arg5: memref<1x128xf32, #tpu.memory_space<vmem>>, %arg6: memref<8x128xf32, #tpu.memory_space<vmem>>) attributes {dimension_semantics = [#tpu.dimension_semantics<parallel>, #tpu.dimension_semantics<parallel>, #tpu.dimension_semantics<arbitrary>], iteration_bounds = array<i64: 1, 1, 1>, scalar_prefetch = 0 : i64, scratch_operands = 0 : i64, tpu.core_type = #tpu.core_type<tc>, window_params = [{transform_indices = @transform_0, window_bounds = array<i64: 8, 128>}, {transform_indices = @transform_1, window_bounds = array<i64: 128, 128>}, {transform_indices = @transform_2, window_bounds = array<i64: 1, 128>}, {transform_indices = @transform_3, window_bounds = array<i64: 8, 128>}]} {
    %c0 = arith.constant 0 : index
    %c0_0 = arith.constant 0 : index
    %0 = vector.load %arg3[%c0, %c0_0] : memref<8x128xf32, #tpu.memory_space<vmem>>, vector<8x128xf32>
    %c0_1 = arith.constant 0 : index
    %c0_2 = arith.constant 0 : index
    %1 = vector.load %arg4[%c0_1, %c0_2] : memref<128x128xf32, #tpu.memory_space<vmem>>, vector<128x128xf32>
    %cst = arith.constant dense<0.000000e+00> : vector<8x128xf32>
    %2 = tpu.matmul %0, %1, %cst {dimension_numbers = #tpu.dot_dimension_numbers<[1], [0], [0], [1], [0, 0, 1, 1], [], []>} : vector<8x128xf32>, vector<128x128xf32>, vector<8x128xf32> -> vector<8x128xf32>
    %c0_3 = arith.constant 0 : index
    %c0_4 = arith.constant 0 : index
    %3 = vector.load %arg5[%c0_3, %c0_4] : memref<1x128xf32, #tpu.memory_space<vmem>>, vector<1x128xf32>
    %4 = vector.broadcast %3 : vector<1x128xf32> to vector<8x128xf32>
    %5 = arith.addf %2, %4 : vector<8x128xf32>
    %c0_5 = arith.constant 0 : index
    %c0_6 = arith.constant 0 : index
    %6 = vector.load %arg6[%c0_5, %c0_6] : memref<8x128xf32, #tpu.memory_space<vmem>>, vector<8x128xf32>
    tpu.vector_store %arg6[%c0_5, %c0_6], %5 {strides = array<i32>} : memref<8x128xf32, #tpu.memory_space<vmem>>, vector<8x128xf32>,
    return
  }
  func.func @transform_0(%arg0: i32, %arg1: i32, %arg2: i32) -> (i32, i32) {
    %c0_i32 = arith.constant 0 : i32
    return %arg0, %arg2 : i32, i32
  }
  func.func @transform_1(%arg0: i32, %arg1: i32, %arg2: i32) -> (i32, i32) {
    %c0_i32 = arith.constant 0 : i32
    return %arg2, %arg1 : i32, i32
  }
  func.func @transform_2(%arg0: i32, %arg1: i32, %arg2: i32) -> (i32, i32) {
    %c0_i32 = arith.constant 0 : i32
    %c0_i32_0 = arith.constant 0 : i32
    return %c0_i32, %arg1 : i32, i32
  }
  func.func @transform_3(%arg0: i32, %arg1: i32, %arg2: i32) -> (i32, i32) {
    %c0_i32 = arith.constant 0 : i32
    return %arg0, %arg1 : i32, i32
  }
}

</mosaic_0001>

<bundles_post_ra>
// kernel: forward.1
= control target key start
LH: loop header
LB: loop body
LE: loop exit
PB: predicated region body
PF: predicated region fallthrough
CT: control target
= control target key end

     0   :  { %8 = vsyncpa [#allocation3], 0  ;;  %s280_s0 = inlined_call_operand.vmem [shape: f32[8,128], index: 0, kind: input, shape index: {}]   ;;  %s281_s1 = inlined_call_operand.hbm [shape: f32[128,128], index: 1, kind: input, shape index: {}]   ;;  %s282_s2 = inlined_call_operand.vmem [shape: f32[1,128], index: 2, kind: input, shape index: {}]   ;;  %s283_s3 = inlined_call_operand.hbm [shape: f32[8,128], index: 3, kind: output, shape index: {}]  }
   0x1   :  { %9 = vsyncpa [#allocation4], 0  ;;  %s242_s12 = smov [#allocation2]  }
   0x2   :  { %s17_s13 = sshll.u32 %s242_s12, 4  ;;  %s18_s13 = int_to_ptr.vmem [resolvable:$true] %s17_s13 }
   0x3   :  { %s206_s14 = scalar_lea.vmem %s18_s13, 2048  ;;  %p211_p1 = scmp.lt.s32.totalorder %s18_s13, %s18_s13 }
   0x4   :  { %p207_p0 = scmp.ne.s32.totalorder %s18_s13, %s206_s14  ;;  %p212_p2 = scmp.lt.s32.totalorder %s206_s14, %s206_s14 }
   0x6   :  { %p213_p3 = por %p212_p2, %p211_p1 }
   0x8   :  { %p214_p4 = pnand %p213_p3, %p207_p0 }
   0xa   :  { %217 = shalt.err (!%p214_p4)
}
   0xb   :  { %s243_s15 = smov 128   ;;  %s244_s16 = smov 8  }
   0xc   :  { %23 = dma.hbm_to_vmem [thread:$0]  %s281_s1, 2048, %s18_s13, [#allocation3], %s243_s15, %s243_s15, %s244_s16  }
   0xd   :  { %238 = dma.done.wait [#allocation3], 2048  }
   0xe   :  { %239 = vsyncadd [#allocation3], 4294965248  ;;  %v245_v0 = vmov 0.0   ;;  %vm246_vm0 = vmmov 0   ;;  %v45_v1 = vld [vmem:[#allocation2 + $0x78] sm:$0xff]  ;;  %v44_v2 = vld [vmem:[#allocation2 + $0x70] sm:$0xff] }
   0xf   :  { %157 = vmatprep.subr.mxu0 %v245_v0  ;;  %189 = vmatprep.mubr.msk.f32.mxu0 %vm246_vm0, %v245_v0  ;;  %v43_v3 = vld [vmem:[#allocation2 + $0x68] sm:$0xff]  ;;  %v42_v4 = vld [vmem:[#allocation2 + $0x60] sm:$0xff]  ;;  %v41_v5 = vld [vmem:[#allocation2 + $0x58] sm:$0xff]  ;;  %s247_s22 = smov [#allocation5]  }
  0x10   :  { %158 = vmatpush3.msra.mxu0 %v45_v1  ;;  %v40_v6 = vld [vmem:[#allocation2 + $0x50] sm:$0xff]  ;;  %v39_v7 = vld [vmem:[#allocation2 + $0x48] sm:$0xff]  ;;  %v38_v8 = vld [vmem:[#allocation2 + $0x40] sm:$0xff]  ;;  %s130_s23 = sshll.u32 %s247_s22, 4  ;;  %s131_s23 = int_to_ptr.vmem [resolvable:$true] %s130_s23 }
  0x11   :  { %159 = vmatprep.subr.mxu0 %v245_v0  ;;  %v37_v9 = vld [vmem:[#allocation2 + $0x38] sm:$0xff]  ;;  %v36_v10 = vld [vmem:[#allocation2 + $0x30] sm:$0xff]  ;;  %v35_v11 = vld [vmem:[#allocation2 + $0x28] sm:$0xff]  ;;  %s218_s24 = scalar_lea.vmem %s131_s23, 128  ;;  %p223_p6 = scmp.lt.s32.totalorder %s131_s23, %s131_s23 }
  0x12   :  { %160 = vmatpush3.msra.mxu0 %v44_v2  ;;  %v34_v12 = vld [vmem:[#allocation2 + $0x20] sm:$0xff]  ;;  %v33_v13 = vld [vmem:[#allocation2 + $0x18] sm:$0xff]  ;;  %v32_v14 = vld [vmem:[#allocation2 + $0x10] sm:$0xff]  ;;  %p219_p5 = scmp.ne.s32.totalorder %s131_s23, %s218_s24  ;;  %p224_p7 = scmp.lt.s32.totalorder %s218_s24, %s218_s24 }
  0x13   :  { %161 = vmatprep.subr.mxu0 %v245_v0  ;;  %v31_v15 = vld [vmem:[#allocation2 + $0x8] sm:$0xff]  ;;  %v30_v16 = vld [vmem:[#allocation2] sm:$0xff] }
  0x14   :  { %162 = vmatpush3.msra.mxu0 %v43_v3  ;;  %v29_v17 = vld [vmem:[%s280_s0] sm:$0xff]  ;;  %p225_p8 = por %p224_p7, %p223_p6 }
  0x15   :  { %163 = vmatprep.subr.mxu0 %v245_v0  ;;  %v139_v18 = vld [vmem:[%s282_s2] ss:$0 sm:$0xff] }
  0x16   :  { %164 = vmatpush3.msra.mxu0 %v42_v4  ;;  %p226_p9 = pnand %p225_p8, %p219_p5 }
  0x17   :  { %165 = vmatprep.subr.mxu0 %v245_v0 }
  0x18   :  { %166 = vmatpush3.msra.mxu0 %v41_v5 }
  0x19   :  { %167 = vmatprep.subr.mxu0 %v245_v0 }
  0x1a   :  { %168 = vmatpush3.msra.mxu0 %v40_v6 }
  0x1b   :  { %169 = vmatprep.subr.mxu0 %v245_v0 }
  0x1c   :  { %170 = vmatpush3.msra.mxu0 %v39_v7 }
  0x1d   :  { %171 = vmatprep.subr.mxu0 %v245_v0 }
  0x1e   :  { %172 = vmatpush3.msra.mxu0 %v38_v8 }
  0x1f   :  { %173 = vmatprep.subr.mxu0 %v245_v0 }
  0x20   :  { %174 = vmatpush3.msra.mxu0 %v37_v9 }
  0x21   :  { %175 = vmatprep.subr.mxu0 %v245_v0 }
  0x22   :  { %176 = vmatpush3.msra.mxu0 %v36_v10 }
  0x23   :  { %177 = vmatprep.subr.mxu0 %v245_v0 }
  0x24   :  { %178 = vmatpush3.msra.mxu0 %v35_v11 }
  0x25   :  { %179 = vmatprep.subr.mxu0 %v245_v0 }
  0x26   :  { %180 = vmatpush3.msra.mxu0 %v34_v12 }
  0x27   :  { %181 = vmatprep.subr.mxu0 %v245_v0 }
  0x28   :  { %182 = vmatpush3.msra.mxu0 %v33_v13 }
  0x29   :  { %183 = vmatprep.subr.mxu0 %v245_v0 }
  0x2a   :  { %184 = vmatpush3.msra.mxu0 %v32_v14 }
  0x2b   :  { %185 = vmatprep.subr.mxu0 %v245_v0 }
  0x2c   :  { %186 = vmatpush3.msra.mxu0 %v31_v15 }
  0x2d   :  { %187 = vmatprep.subr.mxu0 %v245_v0 }
  0x2e   :  { %188 = vmatpush3.msra.mxu0 %v30_v16 }
  0x2f   :  { %190 = vmatmul.mubr.f32.vlgmr.msra.gmra.mxu0 %v29_v17 }
  0xef   :  { %v119_v19 = vpop.f32.mrf.mxu0 }
  0xf0   :  { %v120_v20 = vadd.f32 %v139_v18, %v119_v19 }
  0xf1   :  { %v191_v21 = vpop.f32.mrf.mxu0 }
  0xf2   :  { %123 = vst [vmem:[#allocation5] sm:$0xff] %v120_v20 }
  0xf3   :  { %229 = shalt.err (!%p226_p9)
}
  0xf4   :  { %133 = dma.vmem_to_hbm [thread:$0]  %s131_s23, 128, %s283_s3, [#allocation4]  }
  0xf5   :  { %240 = dma.done.wait [#allocation4], 128  }
  0xf6   :  { %241 = vsyncadd [#allocation4], 4294967168 }
  0xf7   :  { %137 = vsyncpa [#allocation3], 1 }
  0xf8   :  { %138 = vsyncpa [#allocation4], 1 }

</bundles_post_ra>
